<compile_context>
chip_gen: v6e
topology: v6e:2x2x1
jax: 0.10.0
libtpu: 0.0.40
codegen_flags: <defaults>
</compile_context>

<pallas_src>
import numpy as np
import jax
import jax.numpy as jnp
from jax.experimental import pallas as pl
from jax.experimental.pallas import tpu as pltpu


_LANE = 128       # lane width (last-dim granularity)
_SUB_BF16 = 16    # sublane granularity for bf16 blocks (also fine for f32 outputs)


def _round_up(v, m):
    return ((v + m - 1) // m) * m


def _silu_f32(h):
    # exp() and the approximate reciprocal both execute on the EUP slot, which is idle
    # next to the MXU matmuls; the exact divide would burn VALU cycles instead.
    return h * pl.reciprocal(1.0 + jnp.exp(-h), approx=True)


def _ffn_resident_kernel(x_ref, w1_ref, b1_ref, w2_ref, b2_ref, o_ref):
    """One row tile.  W1/W2/b1/b2 have constant index maps => VMEM-resident."""
    h = jnp.dot(x_ref[...], w1_ref[...], preferred_element_type=jnp.float32)
    h = _silu_f32(h + b1_ref[...])
    y = jnp.dot(h.astype(w2_ref.dtype), w2_ref[...], preferred_element_type=jnp.float32)
    o_ref[...] = (y + b2_ref[...]).astype(o_ref.dtype)


def _ffn_tiled_kernel(x_ref, w1_ref, b1_ref, w2_ref, b2_ref, o_ref, acc_ref):
    """(row tile i, hidden tile j) step; hidden axis is the reduction (innermost)."""
    j = pl.program_id(1)

    @pl.when(j == 0)
    def _():
        acc_ref[...] = jnp.zeros_like(acc_ref)

    h = jnp.dot(x_ref[...], w1_ref[...], preferred_element_type=jnp.float32)
    h = _silu_f32(h + b1_ref[...])
    acc_ref[...] += jnp.dot(h.astype(w2_ref.dtype), w2_ref[...],
                            preferred_element_type=jnp.float32)

    @pl.when(j == pl.num_programs(1) - 1)
    def _():
        o_ref[...] = (acc_ref[...] + b2_ref[...]).astype(o_ref.dtype)


def feed_forward(x, w1, b1, w2, b2, *, tm=None, th=None):
    """Fused feed-forward.  x: (..., K); w1: (K, H); b1: (H,); w2: (H, N); b2: (N,).

    Matmuls run in bf16 on the MXU with f32 accumulation; bias + SiLU stay in f32.
    """
    orig_shape = x.shape
    out_dtype = x.dtype
    K = orig_shape[-1]
    H = w1.shape[1]
    N = w2.shape[1]
    assert w1.shape[0] == K and w2.shape[0] == H
    assert b1.shape == (H,) and b2.shape == (N,)
    # Lane-dense feature axes -> unmasked vector stores / full-width DMAs.
    assert H % _LANE == 0 and N % _LANE == 0, \
        "hidden_features and out_features must be multiples of 128"

    x2 = x.reshape(-1, K)
    M = x2.shape[0]
    out_itemsize = jnp.dtype(out_dtype).itemsize

    # ---- Per-generation VMEM budget (v7x: 64 MiB, v6e/v5e: 128 MiB physical). ----
    try:
        vmem_cap = int(pltpu.get_tpu_info().vmem_capacity_bytes)
    except Exception:
        vmem_cap = 64 << 20                     # conservative fallback (v7x)
    vmem_limit = int(vmem_cap * 0.75)           # scoped limit requested from Mosaic
    budget = int(vmem_limit * 0.85)             # headroom for compiler temporaries

    # bf16 weights + f32 biases, kept live for the whole grid in the resident path.
    wbytes = 2 * (K * H + H * N) + 4 * (H + N)
    resident = wbytes <= budget // 3

    # ---- Row tile: large, but keep >= 2 row tiles so the "parallel" axis can shard
    # across both TensorCores on v7x; round padding-friendly to the sublane grain. ----
    if tm is None:
        desired = 512 if resident else 256
        n_tiles = pl.cdiv(M, desired)
        if n_tiles < 2 and M > _SUB_BF16:
            n_tiles = 2
        tm = _round_up(pl.cdiv(M, n_tiles), _SUB_BF16)
    else:
        tm = max(_SUB_BF16, _round_up(tm, _SUB_BF16))

    # ---- Hidden tile (reduction axis) for the streaming-weights path. ----
    if resident:
        th = H
    else:
        if th is None:
            th = min(H, 512)
        th = min(H, max(_LANE, _round_up(th, _LANE)))

    def footprint(tm_, th_):
        if resident:
            return (wbytes
                    + 2 * (tm_ * K * 2)              # x tile, double-buffered (bf16)
                    + 2 * (tm_ * N * out_itemsize)   # out tile, double-buffered
                    + tm_ * H * 4 + tm_ * H * 2)     # f32 intermediate + bf16 copy
        return (2 * (tm_ * K * 2 + K * th_ * 2 + th_ * N * 2 + th_ * 4 + N * 4)
                + 2 * (tm_ * N * out_itemsize)
                + tm_ * N * 4                        # f32 accumulator scratch
                + tm_ * th_ * 4 + tm_ * th_ * 2)     # f32 intermediate + bf16 copy

    # Shrink tiles until the per-step working set fits the budget.
    while footprint(tm, th) > budget and (tm > _SUB_BF16 or ((not resident) and th > _LANE)):
        if (not resident) and th > _LANE and th * N >= tm * K:
            th = max(_LANE, (th // 2) // _LANE * _LANE)
        elif tm > _SUB_BF16:
            tm = max(_SUB_BF16, (tm // 2) // _SUB_BF16 * _SUB_BF16)
        else:
            break
    if not resident:
        th = min(th, H)
        while H % th != 0:        # H is a multiple of 128, so this terminates
            th -= _LANE

    # ---- Pad rows to a multiple of tm (padded rows are discarded after the call). ----
    M_pad = _round_up(M, tm)
    if M_pad != M:
        x2 = jnp.pad(x2, ((0, M_pad - M), (0, 0)))
    n_row = M_pad // tm

    # ---- bf16 MXU operands, f32 biases. ----
    bf16 = jnp.bfloat16
    x_b = x2.astype(bf16)
    w1_b = w1.astype(bf16)
    w2_b = w2.astype(bf16)
    b1_2 = b1.reshape(1, H).astype(jnp.float32)
    b2_2 = b2.reshape(1, N).astype(jnp.float32)

    flops = 2 * M_pad * K * H + 2 * M_pad * H * N
    transcendentals = 2 * M_pad * H                  # exp + approx reciprocal

    if resident:
        compiler_params = pltpu.CompilerParams(
            dimension_semantics=("parallel",), vmem_limit_bytes=vmem_limit)
        bytes_accessed = (2 * M_pad * K + 2 * (K * H + H * N) + 4 * (H + N)
                          + out_itemsize * M_pad * N)
        out = pl.pallas_call(
            _ffn_resident_kernel,
            out_shape=jax.ShapeDtypeStruct((M_pad, N), out_dtype),
            grid_spec=pltpu.PrefetchScalarGridSpec(
                num_scalar_prefetch=0,
                grid=(n_row,),
                in_specs=[
                    pl.BlockSpec((tm, K), lambda i: (i, 0)),   # x row tile (streams)
                    pl.BlockSpec((K, H), lambda i: (0, 0)),    # W1 resident
                    pl.BlockSpec((1, H), lambda i: (0, 0)),    # b1 resident
                    pl.BlockSpec((H, N), lambda i: (0, 0)),    # W2 resident
                    pl.BlockSpec((1, N), lambda i: (0, 0)),    # b2 resident
                ],
                out_specs=pl.BlockSpec((tm, N), lambda i: (i, 0)),
            ),
            compiler_params=compiler_params,
            cost_estimate=pl.CostEstimate(flops=flops, transcendentals=transcendentals,
                                          bytes_accessed=bytes_accessed),
        )(x_b, w1_b, b1_2, w2_b, b2_2)
    else:
        n_hid = H // th
        compiler_params = pltpu.CompilerParams(
            dimension_semantics=("parallel", "arbitrary"), vmem_limit_bytes=vmem_limit)
        # Weights are re-streamed once per row tile in this path.
        bytes_accessed = (2 * M_pad * K
                          + n_row * (2 * (K * H + H * N) + 4 * (H + N))
                          + out_itemsize * M_pad * N)
        # TODO(synk): for very large out_features add an N-tile grid axis
        # (grid (M//tm, N//tn, H//th)) and pl.Buffered(3) weight pipelining on v6e/v5e.
        out = pl.pallas_call(
            _ffn_tiled_kernel,
            out_shape=jax.ShapeDtypeStruct((M_pad, N), out_dtype),
            grid_spec=pltpu.PrefetchScalarGridSpec(
                num_scalar_prefetch=0,
                grid=(n_row, n_hid),
                in_specs=[
                    pl.BlockSpec((tm, K), lambda i, j: (i, 0)),   # x row tile
                    pl.BlockSpec((K, th), lambda i, j: (0, j)),   # W1 hidden tile
                    pl.BlockSpec((1, th), lambda i, j: (0, j)),   # b1 hidden tile
                    pl.BlockSpec((th, N), lambda i, j: (j, 0)),   # W2 hidden tile
                    pl.BlockSpec((1, N), lambda i, j: (0, 0)),    # b2 (resident)
                ],
                out_specs=pl.BlockSpec((tm, N), lambda i, j: (i, 0)),
                scratch_shapes=[pltpu.VMEM((tm, N), jnp.float32)],
            ),
            compiler_params=compiler_params,
            cost_estimate=pl.CostEstimate(flops=flops, transcendentals=transcendentals,
                                          bytes_accessed=bytes_accessed),
        )(x_b, w1_b, b1_2, w2_b, b2_2)

    if M_pad != M:
        out = out[:M]
    return out.reshape(*orig_shape[:-1], N)


def feed_forward_ref(x, w1, b1, w2, b2):
    """Pure-JAX reference mirroring nn.Sequential(Linear, SiLU, Linear) with the same
    bf16-matmul / f32-accumulate numerics as the kernel (SiLU exact sigmoid)."""
    h = jnp.dot(x.astype(jnp.bfloat16), w1.astype(jnp.bfloat16),
                preferred_element_type=jnp.float32) + b1
    h = h * jax.nn.sigmoid(h)
    y = jnp.dot(h.astype(jnp.bfloat16), w2.astype(jnp.bfloat16),
                preferred_element_type=jnp.float32) + b2
    return y.astype(x.dtype)


if __name__ == "__main__":
    # Small, TPU-friendly shapes (lane-dense feature axes).
    batch, seq = 8, 32                        # 256 rows after flattening
    in_features, hidden_features, out_features = 128, 256, 128

    key = jax.random.PRNGKey(0)
    kx, k1, k2, k3, k4 = jax.random.split(key, 5)

    x = jax.random.normal(kx, (batch, seq, in_features), dtype=jnp.float32)
    w1 = jax.random.normal(k1, (in_features, hidden_features), dtype=jnp.float32)
    w1 = w1 * (1.0 / np.sqrt(in_features))
    b1 = 0.01 * jax.random.normal(k2, (hidden_features,), dtype=jnp.float32)
    w2 = jax.random.normal(k3, (hidden_features, out_features), dtype=jnp.float32)
    w2 = w2 * (1.0 / np.sqrt(hidden_features))
    b2 = 0.01 * jax.random.normal(k4, (out_features,), dtype=jnp.float32)

    y = jax.block_until_ready(feed_forward(x, w1, b1, w2, b2))
    y_ref = feed_forward_ref(x, w1, b1, w2, b2)
    # bf16 matmuls + approx-reciprocal sigmoid => slightly looser tolerance than f32.
    np.testing.assert_allclose(np.asarray(y), np.asarray(y_ref), rtol=2e-2, atol=2e-2)
    print("KERNEL_OK")
</pallas_src>

<mosaic_0001>
module attributes {stable_mosaic.version = 11 : i64} {
  func.func @_ffn_resident_kernel(%arg0: i32, %arg1: memref<128x128xbf16, #tpu.memory_space<vmem>>, %arg2: memref<128x256xbf16, #tpu.memory_space<vmem>>, %arg3: memref<1x256xf32, #tpu.memory_space<vmem>>, %arg4: memref<256x128xbf16, #tpu.memory_space<vmem>>, %arg5: memref<1x128xf32, #tpu.memory_space<vmem>>, %arg6: memref<128x128xf32, #tpu.memory_space<vmem>>) attributes {dimension_semantics = [#tpu.dimension_semantics<parallel>], iteration_bounds = array<i64: 2>, scalar_prefetch = 0 : i64, scratch_operands = 0 : i64, tpu.core_type = #tpu.core_type<tc>, window_params = [{transform_indices = @transform_0, window_bounds = array<i64: 128, 128>}, {pipeline_mode = #tpu.pipeline_mode<synchronous>, transform_indices = @transform_1, window_bounds = array<i64: 128, 256>}, {pipeline_mode = #tpu.pipeline_mode<synchronous>, transform_indices = @transform_2, window_bounds = array<i64: 1, 256>}, {pipeline_mode = #tpu.pipeline_mode<synchronous>, transform_indices = @transform_3, window_bounds = array<i64: 256, 128>}, {pipeline_mode = #tpu.pipeline_mode<synchronous>, transform_indices = @transform_4, window_bounds = array<i64: 1, 128>}, {transform_indices = @transform_5, window_bounds = array<i64: 128, 128>}]} {
    %c0 = arith.constant 0 : index
    %c0_0 = arith.constant 0 : index
    %0 = vector.load %arg1[%c0, %c0_0] : memref<128x128xbf16, #tpu.memory_space<vmem>>, vector<128x128xbf16>
    %c0_1 = arith.constant 0 : index
    %c0_2 = arith.constant 0 : index
    %1 = vector.load %arg2[%c0_1, %c0_2] : memref<128x256xbf16, #tpu.memory_space<vmem>>, vector<128x256xbf16>
    %cst = arith.constant dense<0.000000e+00> : vector<128x256xf32>
    %2 = tpu.matmul %0, %1, %cst {dimension_numbers = #tpu.dot_dimension_numbers<[1], [0], [0], [1], [0, 0, 1, 1], [], []>} : vector<128x128xbf16>, vector<128x256xbf16>, vector<128x256xf32> -> vector<128x256xf32>
    %c0_3 = arith.constant 0 : index
    %c0_4 = arith.constant 0 : index
    %3 = vector.load %arg3[%c0_3, %c0_4] : memref<1x256xf32, #tpu.memory_space<vmem>>, vector<1x256xf32>
    %4 = vector.broadcast %3 : vector<1x256xf32> to vector<128x256xf32>
    %5 = arith.addf %2, %4 : vector<128x256xf32>
    %cst_5 = arith.constant 0.000000e+00 : f32
    %6 = vector.broadcast %cst_5 : f32 to vector<128x256xf32>
    %7 = arith.subf %6, %5 : vector<128x256xf32>
    %8 = math.exp %7 : vector<128x256xf32>
    %cst_6 = arith.constant 1.000000e+00 : f32
    %9 = vector.broadcast %cst_6 : f32 to vector<128x256xf32>
    %10 = arith.addf %9, %8 : vector<128x256xf32>
    %11 = tpu.reciprocal %10 {approx = true} : vector<128x256xf32> -> vector<128x256xf32>
    %12 = arith.mulf %5, %11 : vector<128x256xf32>
    %13 = arith.truncf %12 : vector<128x256xf32> to vector<128x256xbf16>
    %c0_7 = arith.constant 0 : index
    %c0_8 = arith.constant 0 : index
    %14 = vector.load %arg4[%c0_7, %c0_8] : memref<256x128xbf16, #tpu.memory_space<vmem>>, vector<256x128xbf16>
    %cst_9 = arith.constant dense<0.000000e+00> : vector<128x128xf32>
    %15 = tpu.matmul %13, %14, %cst_9 {dimension_numbers = #tpu.dot_dimension_numbers<[1], [0], [0], [1], [0, 0, 1, 1], [], []>} : vector<128x256xbf16>, vector<256x128xbf16>, vector<128x128xf32> -> vector<128x128xf32>
    %c0_10 = arith.constant 0 : index
    %c0_11 = arith.constant 0 : index
    %16 = vector.load %arg5[%c0_10, %c0_11] : memref<1x128xf32, #tpu.memory_space<vmem>>, vector<1x128xf32>
    %17 = vector.broadcast %16 : vector<1x128xf32> to vector<128x128xf32>
    %18 = arith.addf %15, %17 : vector<128x128xf32>
    %c0_12 = arith.constant 0 : index
    %c0_13 = arith.constant 0 : index
    %19 = vector.load %arg6[%c0_12, %c0_13] : memref<128x128xf32, #tpu.memory_space<vmem>>, vector<128x128xf32>
    tpu.vector_store %arg6[%c0_12, %c0_13], %18 {strides = array<i32>} : memref<128x128xf32, #tpu.memory_space<vmem>>, vector<128x128xf32>,
    return
  }
  func.func @transform_0(%arg0: i32) -> (i32, i32) {
    %c0_i32 = arith.constant 0 : i32
    %c0_i32_0 = arith.constant 0 : i32
    return %arg0, %c0_i32 : i32, i32
  }
  func.func @transform_1(%arg0: i32) -> (i32, i32) {
    %c0_i32 = arith.constant 0 : i32
    %c0_i32_0 = arith.constant 0 : i32
    %c0_i32_1 = arith.constant 0 : i32
    return %c0_i32, %c0_i32_0 : i32, i32
  }
  func.func @transform_2(%arg0: i32) -> (i32, i32) {
    %c0_i32 = arith.constant 0 : i32
    %c0_i32_0 = arith.constant 0 : i32
    %c0_i32_1 = arith.constant 0 : i32
    return %c0_i32, %c0_i32_0 : i32, i32
  }
  func.func @transform_3(%arg0: i32) -> (i32, i32) {
    %c0_i32 = arith.constant 0 : i32
    %c0_i32_0 = arith.constant 0 : i32
    %c0_i32_1 = arith.constant 0 : i32
    return %c0_i32, %c0_i32_0 : i32, i32
  }
  func.func @transform_4(%arg0: i32) -> (i32, i32) {
    %c0_i32 = arith.constant 0 : i32
    %c0_i32_0 = arith.constant 0 : i32
    %c0_i32_1 = arith.constant 0 : i32
    return %c0_i32, %c0_i32_0 : i32, i32
  }
  func.func @transform_5(%arg0: i32) -> (i32, i32) {
    %c0_i32 = arith.constant 0 : i32
    %c0_i32_0 = arith.constant 0 : i32
    return %arg0, %c0_i32 : i32, i32
  }
}

</mosaic_0001>

<bundles_post_ra>
// kernel: tpu_custom_call.1
= control target key start
LH: loop header
LB: loop body
LE: loop exit
PB: predicated region body
PF: predicated region fallthrough
CT: control target
= control target key end

     0   :  { %10 = vsyncpa [#allocation3], 0  ;;  %s2100_s0 = inlined_call_operand.hbm [shape: bf16[256,128], index: 0, kind: input, shape index: {}]   ;;  %s2101_s1 = inlined_call_operand.hbm [shape: bf16[128,256], index: 1, kind: input, shape index: {}]   ;;  %s2102_s2 = inlined_call_operand.vmem [shape: f32[1,256], index: 2, kind: input, shape index: {}]   ;;  %s2103_s3 = inlined_call_operand.hbm [shape: bf16[256,128], index: 3, kind: input, shape index: {}]   ;;  %s2104_s4 = inlined_call_operand.vmem [shape: f32[1,128], index: 4, kind: input, shape index: {}]   ;;  %s2105_s5 = inlined_call_operand.hbm [shape: f32[256,128], index: 5, kind: output, shape index: {}]  }
   0x1   :  { %12 = vsyncpa [#allocation3 + $0x1], 0 }
   0x2   :  { %13 = vsyncpa [#allocation6], 0 }
   0x3   :  { %14 = vsyncpa [#allocation4], 0 }
   0x4   :  { %16 = vsyncpa [#allocation4 + $0x1], 0  ;;  %s1688_s18 = smov 0   ;;  %s1690_s19 = smov 0  }
   0x5   :  { %s1692_s20 = smov 0   ;;  %s1694_s21 = smov 0  }
   0x6 LB: > { %s1709_s22 = sadd.s32 4294967295, %s1645_s21   ;;  %s1122_s23 = sadd.s32 4294967294, %s1645_s21   ;;  %s1645_s21 = sphi %s1694_s21, %s2129_s21   ;;  %s1641_s20 = sphi %s1692_s20, %s2128_s20   ;;  %s1637_s19 = sphi %s1690_s19, %s2127_s19   ;;  %s1633_s18 = sphi %s1688_s18, %s2126_s18  }
   0x7   : > { %p42_p0 = scmp.ne.s32.totalorder %s1637_s19, %s1633_s18  ;;  %p2106_p1 = scmp.eq.s32.totalorder %s1709_s22, 0 }
   0x8   : > { %p156_p3 = scmp.eq.s32.totalorder %s1122_s23, 1  ;;  %p1123_p5 = scmp.ge.s32.totalorder %s1645_s21, 1 }
   0x9   : > { %p1718_p4 = por %p2106_p1, %p42_p0  ;;  %p163_p7 = scmp.lt.s32.totalorder %s1645_s21, 3 }
   0xa   : > { %p1723_p6 = por %p156_p3, %p42_p0  ;;  %s1647_s27 = smov [#allocation5]  }
   0xb   : > { %s2111_s24 = scalar_select %p1718_p4, 1, 0 }
   0xc   : > { %s2112_s25 = scalar_select %p1723_p6, 1, 0 }
   0xd   : > { %p1728_p8 = pnand %p1123_p5, %p163_p7  ;;  %s175_s28 = sshll.u32 %s1647_s27, 4  ;;  %s176_s28 = int_to_ptr.vmem [resolvable:$true] %s175_s28 }
   0xe   : > { %s1648_s30 = smov [#allocation7]   ;;  %s1508_s7 = scalar_lea.vmem %s176_s28, 2048 }
   0xf   : > { %s2113_s26 = scalar_select %p1728_p8, 1, 0 }
  0x10   : > { %p1259_p9 = pneg %p1728_p8  ;;  %s191_s6 = sshll.u32 %s1648_s30, 4  ;;  %s192_s6 = int_to_ptr.vmem [resolvable:$true] %s191_s6 }
  0x11   : > { %p1509_p13 = scmp.ne.s32.totalorder %s176_s28, %s1508_s7  ;;  %p1516_p5 = scmp.lt.s32.totalorder %s176_s28, %s176_s28 }
  0x12   : > { %p1737_p11 = pnand %p1259_p9, %p2106_p1  ;;  %p1517_p7 = scmp.lt.s32.totalorder %s1508_s7, %s1508_s7 }
  0x14   : > { %p1499_p12 = pneg %p1737_p11  ;;  %p1518_p10 = por %p1517_p7, %p1516_p5 }
  0x16   : > { %p1511_p0 = pnand %p1509_p13, %p1499_p12 }
  0x18   : > { %p1512_p3 = pneg %p1511_p0 }
  0x1a   : > { %p1519_p9 = pnand %p1518_p10, %p1512_p3 }
  0x1c   : > { %1522 = shalt.err (!%p1519_p9)
}
  0x1d   : > { %s1649_s8 = smov 128   ;;  %s1650_s9 = smov 8  }
  0x1e   : > { %1262 = dma.hbm_to_vmem [thread:$0]  (!%p1737_p11), %s2101_s1, 2048, %s176_s28, [#allocation6], %s1649_s8, %s1649_s8, %s1650_s9  }
  0x1f   : > { %s1534_s12 = scalar_lea.vmem %s192_s6, 2048  ;;  %p1542_p2 = scmp.lt.s32.totalorder %s192_s6, %s192_s6 }
  0x20   : > { %p1535_p1 = scmp.ne.s32.totalorder %s192_s6, %s1534_s12  ;;  %p1543_p6 = scmp.lt.s32.totalorder %s1534_s12, %s1534_s12 }
  0x22   : > { %p1537_p13 = pnand %p1535_p1, %p1499_p12  ;;  %p1544_p5 = por %p1543_p6, %p1542_p2 }
  0x24   : > { %p1538_p0 = pneg %p1537_p13 }
  0x26   : > { %p1545_p10 = pnand %p1544_p5, %p1538_p0 }
  0x28   : > { %1548 = shalt.err (!%p1545_p10)
}
  0x29   : > { %s2107_s13 = smov 64   ;;  %s1652_s14 = smov 4  }
  0x2a   : > { %1265 = dma.hbm_to_vmem [thread:$0]  (!%p1737_p11), %s2103_s3, 2048, %s192_s6, [#allocation6], %s2107_s13, %s2107_s13, %s1652_s14  }
  0x2b   : > { %s1763_s17 = sadd.s32 1, %s1645_s21   ;;  %s29_s27 = sadd.s32 1, %s1641_s20 }
  0x2c   : > { %s26_s23 = ssub.s32 %s1645_s21, %s1763_s17  ;;  %p36_p2 = scmp.ne.s32.totalorder %s1641_s20, %s1637_s19 }
  0x2d   : > { %p27_p1 = scmp.eq.s32.totalorder %s26_s23, 0  ;;  %p37_p6 = scmp.eq.s32.totalorder %s1645_s21, 0 }
  0x2e   : > { %p2115_p3 = scmp.eq.s32.totalorder %s1709_s22, 1  ;;  %p1276_p9 = scmp.lt.s32.totalorder %s1645_s21, 2 }
  0x2f   : > { %s1772_s28 = scalar_select %p27_p1, %s1641_s20, %s29_s27  }
  0x30   : > { %p38_p12 = por %p37_p6, %p36_p2  ;;  %p1776_p7 = por %p2115_p3, %p36_p2 }
  0x31   : > { %s208_s30 = sand.u32 1, %s1641_s20   ;;  %s1181_s6 = sshll.u32 %s1645_s21, 10 }
  0x32   : > { %s2116_s29 = scalar_select %p1776_p7, 1, 0 }
  0x33   : > { %s1127_s7 = sshll.u32 %s208_s30, 6  ;;  %s1786_s10 = scalar_lea.hbm %s2100_s0, %s1181_s6 }
  0x34   : > { %s212_s11 = scalar_lea.vmem [#allocation2], %s1127_s7  ;;  %p1790_p11 = pnand %p1276_p9, %p38_p12 }
  0x35   : > { %s219_s12 = sshll.u32 %s212_s11, 4  ;;  %s1794_s16 = scalar_lea.sflag [#allocation3], %s208_s30  ;;  %s1788_s12 = int_to_ptr.vmem [resolvable:$true] %s219_s12 }
  0x36   : > { %s1549_s23 = scalar_lea.hbm %s1786_s10, 1024  ;;  %p1551_p0 = pneg %p1790_p11 }
  0x37   : > { %p1550_p13 = scmp.ne.s32.totalorder %s1786_s10, %s1549_s23  ;;  %s1554_s7 = scalar_lea.hbm %s2100_s0, 2048 }
  0x38   : > { %p1555_p1 = scmp.lt.s32.totalorder %s1786_s10, %s2100_s0  ;;  %p1556_p2 = scmp.lt.s32.totalorder %s1554_s7, %s1549_s23 }
  0x39   : > { %p1552_p5 = pnand %p1551_p0, %p1550_p13 }
  0x3a   : > { %p1557_p6 = por %p1556_p2, %p1555_p1 }
  0x3b   : > { %p1553_p10 = pneg %p1552_p5 }
  0x3d   : > { %p1558_p12 = pnand %p1557_p6, %p1553_p10 }
  0x3f   : > { %1561 = shalt.err (!%p1558_p12)
}
  0x40   : > { %s1562_s30 = scalar_lea.vmem %s1788_s12, 1024  ;;  %s1653_s11 = smov [#allocation2]  }
  0x41   : > { %p1563_p3 = scmp.ne.s32.totalorder %s1788_s12, %s1562_s30  ;;  %s1567_s13 = sshll.u32 %s1653_s11, 4  ;;  %s1568_s13 = int_to_ptr.vmem [resolvable:$false] %s1567_s13 }
  0x42   : > { %s1569_s27 = scalar_lea.vmem %s1568_s13, 2048  ;;  %p1570_p5 = scmp.lt.s32.totalorder %s1788_s12, %s1568_s13 }
  0x43   : > { %p1565_p9 = pnand %p1563_p3, %p1551_p0  ;;  %p1571_p7 = scmp.lt.s32.totalorder %s1569_s27, %s1562_s30 }
  0x45   : > { %p1566_p13 = pneg %p1565_p9  ;;  %p1572_p4 = por %p1571_p7, %p1570_p5 }
  0x47   : > { %p1573_p8 = pnand %p1572_p4, %p1566_p13 }
  0x49   : > { %1576 = shalt.err (!%p1573_p8)
}
  0x4a   : > { %s2118_s23 = smov 64   ;;  %p2119_p0 = scmp.ne.s32.totalorder %s2113_s26, 0 }
  0x4b   : > { %1269 = dma.hbm_to_vmem [thread:$0]  (!%p1790_p11), %s1786_s10, 1024, %s1788_s12, %s1794_s16, %s2118_s23, %s2118_s23, %s1652_s14  }
  0x4c   : > { %231 = sbr.rel (%p2119_p0) target bundleno = 633 (0x279), region = 40  ;;  %s1821_s6 = sand.u32 (!%p2119_p0), 1, %s1637_s19  }
  0x4d   : > { %s1131_s13 = sshll.u32 (!%p2119_p0), %s1821_s6, 6  ;;  %s234_s7 = scalar_lea.sflag (!%p2119_p0), [#allocation3], %s1821_s6 }
  0x4e   : > { %s1825_s8 = scalar_lea.vmem (!%p2119_p0), [#allocation2], %s1131_s13  ;;  %p2120_p4 = scmp.ne.s32.totalorder (!%p2119_p0), %s2111_s24, 0 }
  0x51   : > { %1620 = dma.done.wait (%p2120_p4), %s234_s7, 1024  }
  0x52   : > { %1622 = vsyncadd (%p2120_p4), %s234_s7, 4294966272  ;;  %p2121_p8 = scmp.eq.s32.totalorder %s1709_s22, 0 }
  0x54   : > { %1624 = dma.done.wait (%p2121_p8), [#allocation6], 4096   ;;  %p2122_p7 = pmov %p2121_p8 }
  0x55   : > { %v1654_v0 = vmov 0   ;;  %v1321_v1 = vld [vmem:[#allocation5 + $0x74] ss:$8 sps:$4 sm:$0xff]   ;;  %v1323_v2 = vld [vmem:[#allocation5 + $0x70] ss:$8 sps:$4 sm:$0xff]   ;;  %v1345_v17 = vld [vmem:[%s1825_s8] sm:$0xff]   ;;  %v309_v41 = vlaneseq }
  0x56   : > { %1626 = vsyncadd (%p2122_p7), [#allocation6], 4294963200  ;;  %479 = vmatprep.mubr.bf16.mxu0 %v1654_v0  ;;  %447 = vmatprep.subr.bf16.mxu0 %v1321_v1  ;;  %v1324_v3 = vld [vmem:[#allocation5 + $0x64] ss:$8 sps:$4 sm:$0xff]   ;;  %v1326_v4 = vld [vmem:[#allocation5 + $0x60] ss:$8 sps:$4 sm:$0xff]  }
  0x57   : > { %448 = vmatpush1.bf16.msra.mxu0 %v1323_v2  ;;  %v1327_v5 = vld [vmem:[#allocation5 + $0x54] ss:$8 sps:$4 sm:$0xff]   ;;  %v1329_v6 = vld [vmem:[#allocation5 + $0x50] ss:$8 sps:$4 sm:$0xff]   ;;  %v1330_v7 = vld [vmem:[#allocation5 + $0x44] ss:$8 sps:$4 sm:$0xff]  }
  0x58   : > { %449 = vmatprep.subr.bf16.mxu0 %v1324_v3  ;;  %v1332_v8 = vld [vmem:[#allocation5 + $0x40] ss:$8 sps:$4 sm:$0xff]   ;;  %v1333_v9 = vld [vmem:[#allocation5 + $0x34] ss:$8 sps:$4 sm:$0xff]   ;;  %v1335_v10 = vld [vmem:[#allocation5 + $0x30] ss:$8 sps:$4 sm:$0xff]  }
  0x59   : > { %v1336_v11 = vld [vmem:[#allocation5 + $0x24] ss:$8 sps:$4 sm:$0xff]   ;;  %v1338_v12 = vld [vmem:[#allocation5 + $0x20] ss:$8 sps:$4 sm:$0xff]   ;;  %v1339_v13 = vld [vmem:[#allocation5 + $0x14] ss:$8 sps:$4 sm:$0xff]  }
  0x5a   : > { %v1341_v14 = vld [vmem:[#allocation5 + $0x10] ss:$8 sps:$4 sm:$0xff]   ;;  %v1342_v15 = vld [vmem:[#allocation5 + $0x4] ss:$8 sps:$4 sm:$0xff]   ;;  %v1344_v16 = vld [vmem:[#allocation5] ss:$8 sps:$4 sm:$0xff]  }
  0x5b   : > { %450 = vmatpush1.bf16.msra.mxu0 %v1326_v4  ;;  %v1346_v18 = vld [vmem:[%s1825_s8 + $0x8] sm:$0xff]   ;;  %v1347_v19 = vld [vmem:[%s1825_s8 + $0x10] sm:$0xff]   ;;  %v1348_v20 = vld [vmem:[%s1825_s8 + $0x18] sm:$0xff]   ;;  %v310_v42 = vshrl.u32 %v309_v41, 7  ;;  %s1134_s14 = sshll.u32 %s1821_s6, 7  ;;  %s1182_s16 = sshll.u32 %s1709_s22, 11 }
  0x5c   : > { %451 = vmatprep.subr.bf16.mxu0 %v1327_v5  ;;  %v1349_v21 = vld [vmem:[%s1825_s8 + $0x20] sm:$0xff]   ;;  %v1350_v22 = vld [vmem:[%s1825_s8 + $0x28] sm:$0xff]   ;;  %v1351_v23 = vld [vmem:[%s1825_s8 + $0x30] sm:$0xff]   ;;  %s2017_s15 = scalar_lea.vmem [#allocation8], %s1134_s14  ;;  %s2053_s27 = scalar_lea.hbm %s2105_s5, %s1182_s16 }
  0x5d   : > { %v1352_v24 = vld [vmem:[%s1825_s8 + $0x38] sm:$0xff]   ;;  %v1355_v27 = vld [vmem:[#allocation7 + $0x70] sm:$0xff]   ;;  %v1357_v29 = vld [vmem:[#allocation7 + $0x68] sm:$0xff]   ;;  %v311_v43 = vsub.s32 0, %v310_v42  ;;  %v315_v45 = vsub.s32 1, %v310_v42  ;;  %s1030_s9 = sshll.u32 %s2017_s15, 4  ;;  %s2055_s9 = int_to_ptr.vmem [resolvable:$true] %s1030_s9 }
  0x5e   : > { %v1353_v25 = vld [vmem:[#allocation7 + $0x78] sm:$0xff]   ;;  %v1356_v28 = vld [vmem:[#allocation7 + $0x30] sm:$0xff]   ;;  %v1358_v30 = vld [vmem:[#allocation7 + $0x28] sm:$0xff]   ;;  %s1017_s23 = scalar_lea.sflag [#allocation4], %s1821_s6  ;;  %s1577_s13 = scalar_lea.vmem %s2055_s9, 2048 }
  0x5f   : > { %452 = vmatpush1.bf16.msra.mxu0 %v1329_v6  ;;  %v1354_v26 = vld [vmem:[#allocation7 + $0x38] sm:$0xff]   ;;  %1183 = vmatprep.subr.bf16.mxu1 %v1353_v25  ;;  %v1359_v31 = vld [vmem:[#allocation7 + $0x60] sm:$0xff]   ;;  %v1363_v35 = vld [vmem:[#allocation7 + $0x50] sm:$0xff]   ;;  %p1578_p11 = scmp.ne.s32.totalorder %s2055_s9, %s1577_s13  ;;  %p2123_p10 = scmp.ne.s32.totalorder %s2116_s29, 0 }
  0x60   : > { %453 = vmatprep.subr.bf16.mxu0 %v1330_v7  ;;  %1184 = vmatpush3.bf16.msra.mxu1 %v1354_v26  ;;  %v1360_v32 = vld [vmem:[#allocation7 + $0x20] sm:$0xff]   ;;  %v1361_v33 = vld [vmem:[#allocation7 + $0x58] sm:$0xff]   ;;  %v1364_v36 = vld [vmem:[#allocation7 + $0x10] sm:$0xff]   ;;  %s1655_s22 = smov [#allocation8]  }
  0x61   : > { %1185 = vmatprep.subr.bf16.mxu1 %v1355_v27  ;;  %v1362_v34 = vld [vmem:[#allocation7 + $0x18] sm:$0xff]   ;;  %v1365_v37 = vld [vmem:[#allocation7 + $0x48] sm:$0xff]   ;;  %v1367_v39 = vld [vmem:[#allocation7 + $0x40] sm:$0xff]   ;;  %p1579_p1 = pnand %p1578_p11, %p2123_p10  ;;  %s1581_s7 = sshll.u32 %s1655_s22, 4  ;;  %s1582_s7 = int_to_ptr.vmem [resolvable:$false] %s1581_s7 }
  0x62   : > { %v1366_v38 = vld [vmem:[#allocation7 + $0x8] sm:$0xff]   ;;  %v1368_v40 = vld [vmem:[#allocation7] sm:$0xff]   ;;  %s1583_s8 = scalar_lea.vmem %s1582_s7, 4096  ;;  %p1584_p6 = scmp.lt.s32.totalorder %s2055_s9, %s1582_s7 }
  0x63   : > { %454 = vmatpush1.bf16.msra.mxu0 %v1332_v8  ;;  %v307_v44 = vld [vmem:[%s2102_s2] sm:$0x3]  ;;  %p1580_p2 = pneg %p1579_p1  ;;  %p1585_p12 = scmp.lt.s32.totalorder %s1583_s8, %s1577_s13 }
  0x64   : > { %455 = vmatprep.subr.bf16.mxu0 %v1333_v9  ;;  %1186 = vmatpush3.bf16.msra.mxu1 %v1356_v28  ;;  %v1846_v46 = vrot.slane %v307_v44, %v311_v43  ;;  %v1848_v47 = vrot.slane %v307_v44, %v315_v45 }
  0x65   : > { %1187 = vmatprep.subr.bf16.mxu1 %v1357_v29  ;;  %p1586_p3 = por %p1585_p12, %p1584_p6 }
  0x67   : > { %456 = vmatpush1.bf16.msra.mxu0 %v1335_v10  ;;  %p1587_p9 = pnand %p1586_p3, %p1580_p2 }
  0x68   : > { %457 = vmatprep.subr.bf16.mxu0 %v1336_v11  ;;  %1188 = vmatpush3.bf16.msra.mxu1 %v1358_v30 }
  0x69   : > { %1189 = vmatprep.subr.bf16.mxu1 %v1359_v31 }
  0x6b   : > { %458 = vmatpush1.bf16.msra.mxu0 %v1338_v12 }
  0x6c   : > { %459 = vmatprep.subr.bf16.mxu0 %v1339_v13  ;;  %1190 = vmatpush3.bf16.msra.mxu1 %v1360_v32 }
  0x6d   : > { %1191 = vmatprep.subr.bf16.mxu1 %v1361_v33 }
  0x6f   : > { %460 = vmatpush1.bf16.msra.mxu0 %v1341_v14 }
  0x70   : > { %461 = vmatprep.subr.bf16.mxu0 %v1342_v15  ;;  %1192 = vmatpush3.bf16.msra.mxu1 %v1362_v34 }
  0x71   : > { %1193 = vmatprep.subr.bf16.mxu1 %v1363_v35 }
  0x73   : > { %462 = vmatpush1.bf16.msra.mxu0 %v1344_v16 }
  0x74   : > { %1194 = vmatpush3.bf16.msra.mxu1 %v1364_v36 }
  0x75   : > { %1195 = vmatprep.subr.bf16.mxu1 %v1365_v37 }
  0x76   : > { %480 = vmatmul.mubr.bf16.vlgmr.msra.gmra.mxu0 %v1345_v17 }
  0x77   : > { %489 = vmatprep.mubr.bf16.mxu0 %v1654_v0 }
  0x78   : > { %1196 = vmatpush3.bf16.msra.mxu1 %v1366_v38 }
  0x79   : > { %1197 = vmatprep.subr.bf16.mxu1 %v1367_v39 }
  0x7c   : > { %1198 = vmatpush3.bf16.msra.mxu1 %v1368_v40 }
  0x7e   : > { %490 = vmatmul.mubr.bf16.gmra.mxu0 %v1346_v18 }
  0x7f   : > { %499 = vmatprep.mubr.bf16.mxu0 %v1654_v0 }
  0x86   : > { %500 = vmatmul.mubr.bf16.gmra.mxu0 %v1347_v19 }
  0x87   : > { %509 = vmatprep.mubr.bf16.mxu0 %v1654_v0 }
  0x8e   : > { %510 = vmatmul.mubr.bf16.gmra.mxu0 %v1348_v20 }
  0x8f   : > { %519 = vmatprep.mubr.bf16.mxu0 %v1654_v0 }
  0x96   : > { %520 = vmatmul.mubr.bf16.gmra.mxu0 %v1349_v21 }
  0x97   : > { %529 = vmatprep.mubr.bf16.mxu0 %v1654_v0 }
  0x9e   : > { %530 = vmatmul.mubr.bf16.gmra.mxu0 %v1350_v22 }
  0x9f   : > { %539 = vmatprep.mubr.bf16.mxu0 %v1654_v0 }
  0xa6   : > { %540 = vmatmul.mubr.bf16.gmra.mxu0 %v1351_v23 }
  0xa7   : > { %549 = vmatprep.mubr.bf16.mxu0 %v1654_v0 }
  0xae   : > { %550 = vmatmul.mubr.bf16.gmra.mxu0 %v1352_v24 }
 0x136   : > { %v481_v48 = vpop.f32.mrf.mxu0 }
 0x137   : > { %v1851_v49 = vadd.f32 %v481_v48, %v1846_v46 }
 0x138   : > { %v483_v50 = vpop.f32.mrf.mxu0 }
 0x139   : > { %v560_v51 = vsub.f32 0.0, %v1851_v49  ;;  %v1855_v52 = vadd.f32 %v483_v50, %v1848_v47 }
 0x13a   : > { %v485_v53 = vpop.f32.mrf.mxu0 }
 0x13b   : > { %v592_v54 = vmul.f32 1.442695, %v560_v51  ;;  %v561_v55 = vsub.f32 0.0, %v1855_v52  ;;  %v1859_v56 = vadd.f32 %v485_v53, %v1846_v46 }
 0x13c   : > { %v487_v57 = vpop.f32.mrf.mxu0 }
 0x13d   : > { %1369 = vpow2.f32 %v592_v54  ;;  %v594_v58 = vmul.f32 1.442695, %v561_v55  ;;  %v562_v59 = vsub.f32 0.0, %v1859_v56  ;;  %v1863_v60 = vadd.f32 %v487_v57, %v1848_v47 }
 0x13e   : > { %v491_v61 = vpop.f32.mrf.mxu0 }
 0x13f   : > { %1371 = vpow2.f32 %v594_v58  ;;  %v596_v62 = vmul.f32 1.442695, %v562_v59  ;;  %v563_v63 = vsub.f32 0.0, %v1863_v60  ;;  %v1867_v0 = vadd.f32 %v491_v61, %v1846_v46 }
 0x140   : > { %v493_v1 = vpop.f32.mrf.mxu0 }
 0x141   : > { %1373 = vpow2.f32 %v596_v62  ;;  %v598_v2 = vmul.f32 1.442695, %v563_v63  ;;  %v564_v3 = vsub.f32 0.0, %v1867_v0  ;;  %v1871_v4 = vadd.f32 %v493_v1, %v1848_v47 }
 0x142   : > { %v495_v5 = vpop.f32.mrf.mxu0 }
 0x143   : > { %1375 = vpow2.f32 %v598_v2  ;;  %v600_v6 = vmul.f32 1.442695, %v564_v3  ;;  %v565_v7 = vsub.f32 0.0, %v1871_v4  ;;  %v1875_v8 = vadd.f32 %v495_v5, %v1846_v46 }
 0x144   : > { %v497_v9 = vpop.f32.mrf.mxu0 }
 0x145   : > { %1377 = vpow2.f32 %v600_v6  ;;  %v602_v10 = vmul.f32 1.442695, %v565_v7  ;;  %v566_v11 = vsub.f32 0.0, %v1875_v8  ;;  %v1879_v12 = vadd.f32 %v497_v9, %v1848_v47 }
 0x146   : > { %v501_v13 = vpop.f32.mrf.mxu0 }
 0x147   : > { %1379 = vpow2.f32 %v602_v10  ;;  %v604_v14 = vmul.f32 1.442695, %v566_v11  ;;  %v567_v15 = vsub.f32 0.0, %v1879_v12  ;;  %v1883_v16 = vadd.f32 %v501_v13, %v1846_v46 }
 0x148   : > { %v503_v17 = vpop.f32.mrf.mxu0 }
 0x149   : > { %1381 = vpow2.f32 %v604_v14  ;;  %v606_v18 = vmul.f32 1.442695, %v567_v15  ;;  %v568_v19 = vsub.f32 0.0, %v1883_v16  ;;  %v1887_v20 = vadd.f32 %v503_v17, %v1848_v47 }
 0x14a   : > { %v1370_v21 = vpop.eup %1369  ;;  %v505_v22 = vpop.f32.mrf.mxu0 }
 0x14b   : > { %v656_v23 = vadd.f32 1.0, %v1370_v21  ;;  %1383 = vpow2.f32 %v606_v18  ;;  %v608_v24 = vmul.f32 1.442695, %v568_v19  ;;  %v569_v25 = vsub.f32 0.0, %v1887_v20 }
 0x14c   : > { %v1372_v26 = vpop.eup %1371  ;;  %v1891_v27 = vadd.f32 %v505_v22, %v1846_v46  ;;  %v507_v28 = vpop.f32.mrf.mxu0 }
 0x14d   : > { %1385 = vrcp.f32 %v656_v23  ;;  %v657_v29 = vadd.f32 1.0, %v1372_v26  ;;  %v610_v30 = vmul.f32 1.442695, %v569_v25  ;;  %v1894_v31 = vadd.f32 %v507_v28, %v1848_v47 }
 0x14e   : > { %v1374_v32 = vpop.eup %1373  ;;  %1387 = vpow2.f32 %v608_v24  ;;  %v570_v33 = vsub.f32 0.0, %v1891_v27  ;;  %v511_v34 = vpop.f32.mrf.mxu0 }
 0x14f   : > { %1389 = vrcp.f32 %v657_v29  ;;  %v658_v35 = vadd.f32 1.0, %v1374_v32  ;;  %v571_v36 = vsub.f32 0.0, %v1894_v31  ;;  %v1899_v37 = vadd.f32 %v511_v34, %v1846_v46 }
 0x150   : > { %v1376_v38 = vpop.eup %1375  ;;  %1391 = vpow2.f32 %v610_v30  ;;  %v612_v39 = vmul.f32 1.442695, %v570_v33  ;;  %v513_v40 = vpop.f32.mrf.mxu0 }
 0x151   : > { %1393 = vrcp.f32 %v658_v35  ;;  %v659_v41 = vadd.f32 1.0, %v1376_v38  ;;  %v614_v42 = vmul.f32 1.442695, %v571_v36  ;;  %v572_v43 = vsub.f32 0.0, %v1899_v37 }
 0x152   : > { %v1378_v44 = vpop.eup %1377  ;;  %1395 = vpow2.f32 %v612_v39  ;;  %v1903_v45 = vadd.f32 %v513_v40, %v1848_v47  ;;  %v515_v48 = vpop.f32.mrf.mxu0 }
 0x153   : > { %1397 = vrcp.f32 %v659_v41  ;;  %v660_v50 = vadd.f32 1.0, %v1378_v44  ;;  %v616_v51 = vmul.f32 1.442695, %v572_v43  ;;  %v1906_v53 = vadd.f32 %v515_v48, %v1846_v46 }
 0x154   : > { %v1380_v54 = vpop.eup %1379  ;;  %1399 = vpow2.f32 %v614_v42  ;;  %v573_v55 = vsub.f32 0.0, %v1903_v45  ;;  %v517_v57 = vpop.f32.mrf.mxu0 }
 0x155   : > { %1401 = vrcp.f32 %v660_v50  ;;  %v661_v58 = vadd.f32 1.0, %v1380_v54  ;;  %v574_v59 = vsub.f32 0.0, %v1906_v53  ;;  %v1911_v61 = vadd.f32 %v517_v57, %v1848_v47 }
 0x156   : > { %v1382_v62 = vpop.eup %1381  ;;  %1403 = vpow2.f32 %v616_v51  ;;  %v618_v63 = vmul.f32 1.442695, %v573_v55  ;;  %v521_v1 = vpop.f32.mrf.mxu0 }
 0x157   : > { %1405 = vrcp.f32 %v661_v58  ;;  %v662_v2 = vadd.f32 1.0, %v1382_v62  ;;  %v620_v3 = vmul.f32 1.442695, %v574_v59  ;;  %v575_v5 = vsub.f32 0.0, %v1911_v61 }
 0x158   : > { %v1384_v6 = vpop.eup %1383  ;;  %1407 = vpow2.f32 %v618_v63  ;;  %v1915_v7 = vadd.f32 %v521_v1, %v1846_v46  ;;  %v523_v9 = vpop.f32.mrf.mxu0 }
 0x159   : > { %1409 = vrcp.f32 %v662_v2  ;;  %v663_v10 = vadd.f32 1.0, %v1384_v6  ;;  %v622_v11 = vmul.f32 1.442695, %v575_v5  ;;  %v1918_v13 = vadd.f32 %v523_v9, %v1848_v47 }
 0x15a   : > { %v1386_v14 = vpop.eup %1385  ;;  %1411 = vpow2.f32 %v620_v3  ;;  %v576_v15 = vsub.f32 0.0, %v1915_v7  ;;  %v525_v17 = vpop.f32.mrf.mxu0 }
 0x15b   : > { %v1388_v18 = vpop.eup %1387  ;;  %1413 = vrcp.f32 %v663_v10  ;;  %v577_v19 = vsub.f32 0.0, %v1918_v13  ;;  %v1923_v21 = vadd.f32 %v525_v17, %v1846_v46  ;;  %v720_v62 = vmul.f32 %v1386_v14, %v1851_v49 }
 0x15c   : > { %v1390_v22 = vpop.eup %1389  ;;  %v664_v23 = vadd.f32 1.0, %v1388_v18  ;;  %1415 = vpow2.f32 %v622_v11  ;;  %v624_v24 = vmul.f32 1.442695, %v576_v15  ;;  %v527_v25 = vpop.f32.mrf.mxu0 }
 0x15d   : > { %v1392_v26 = vpop.eup %1391  ;;  %v626_v28 = vmul.f32 1.442695, %v577_v19  ;;  %v578_v29 = vsub.f32 0.0, %v1923_v21  ;;  %v1927_v30 = vadd.f32 %v527_v25, %v1848_v47  ;;  %v721_v58 = vmul.f32 %v1390_v22, %v1855_v52 }
 0x15e   : > { %v1394_v32 = vpop.eup %1393  ;;  %1417 = vrcp.f32 %v664_v23  ;;  %v665_v33 = vadd.f32 1.0, %v1392_v26  ;;  %v531_v34 = vpop.f32.mrf.mxu0 }
 0x15f   : > { %v1396_v35 = vpop.eup %1395  ;;  %1419 = vpow2.f32 %v624_v24  ;;  %v628_v36 = vmul.f32 1.442695, %v578_v29  ;;  %v579_v38 = vsub.f32 0.0, %v1927_v30  ;;  %v722_v40 = vmul.f32 %v1394_v32, %v1859_v56 }
 0x160   : > { %v1398_v39 = vpop.eup %1397  ;;  %1421 = vrcp.f32 %v665_v33  ;;  %v666_v41 = vadd.f32 1.0, %v1396_v35  ;;  %v1932_v42 = vadd.f32 %v531_v34, %v1846_v46  ;;  %v533_v43 = vpop.f32.mrf.mxu0 }
 0x161   : > { %v1400_v44 = vpop.eup %1399  ;;  %1423 = vpow2.f32 %v626_v28  ;;  %v630_v48 = vmul.f32 1.442695, %v579_v38  ;;  %v1935_v50 = vadd.f32 %v533_v43, %v1848_v47  ;;  %v723_v51 = vmul.f32 %v1398_v39, %v1863_v60 }
 0x162   : > { %v1402_v54 = vpop.eup %1401  ;;  %1425 = vrcp.f32 %v666_v41  ;;  %v667_v55 = vadd.f32 1.0, %v1400_v44  ;;  %v580_v57 = vsub.f32 0.0, %v1932_v42  ;;  %v535_v56 = vpop.f32.mrf.mxu0  ;;  %v752_v11 = vpack.c.bf16 %v722_v40, %v720_v62 }
 0x163   : > { %v1404_v59 = vpop.eup %1403  ;;  %1427 = vpow2.f32 %v628_v36  ;;  %v581_v63 = vsub.f32 0.0, %v1935_v50  ;;  %v1943_v1 = vadd.f32 %v535_v56, %v1846_v46  ;;  %v753_v6 = vpack.c.bf16 %v723_v51, %v721_v58 }
 0x164   : > { %v1406_v2 = vpop.eup %1405  ;;  %1429 = vrcp.f32 %v667_v55  ;;  %v668_v60 = vadd.f32 1.0, %v1404_v59  ;;  %v632_v3 = vmul.f32 1.442695, %v580_v57  ;;  %v537_v5 = vpop.f32.mrf.mxu0  ;;  %v724_v19 = vmul.f32 %v1402_v54, %v1867_v0 }
 0x165   : > { %v1408_v9 = vpop.eup %1407  ;;  %1431 = vpow2.f32 %v630_v48  ;;  %v634_v10 = vmul.f32 1.442695, %v581_v63  ;;  %v582_v52 = vsub.f32 0.0, %v1943_v1  ;;  %v1947_v14 = vadd.f32 %v537_v5, %v1848_v47  ;;  %935 = vmatprep.mubr.bf16.mxu1 %v753_v6 }
 0x166   : > { %v1410_v15 = vpop.eup %1409  ;;  %1433 = vrcp.f32 %v668_v60  ;;  %v669_v49 = vadd.f32 1.0, %v1408_v9  ;;  %v541_v17 = vpop.f32.mrf.mxu0  ;;  %936 = vmatmul.mubr.bf16.vlgmr.msra.gmra.mxu1 %v752_v11  ;;  %v725_v35 = vmul.f32 %v1406_v2, %v1871_v4 }
 0x167   : > { %v1412_v18 = vpop.eup %1411  ;;  %1435 = vpow2.f32 %v632_v3  ;;  %v636_v22 = vmul.f32 1.442695, %v582_v52  ;;  %v1951_v23 = vadd.f32 %v541_v17, %v1846_v46  ;;  %v726_v25 = vmul.f32 %v1410_v15, %v1875_v8 }
 0x168   : > { %v1414_v24 = vpop.eup %1413  ;;  %1437 = vrcp.f32 %v669_v49  ;;  %v670_v26 = vadd.f32 1.0, %v1412_v18  ;;  %v583_v28 = vsub.f32 0.0, %v1947_v14  ;;  %v543_v29 = vpop.f32.mrf.mxu0 }
 0x169   : > { %v1416_v32 = vpop.eup %1415  ;;  %v727_v33 = vmul.f32 %v1414_v24, %v1879_v12  ;;  %1439 = vpow2.f32 %v634_v10  ;;  %v584_v0 = vsub.f32 0.0, %v1951_v23  ;;  %v1958_v34 = vadd.f32 %v543_v29, %v1848_v47 }
 0x16a   : > { %1441 = vrcp.f32 %v670_v26  ;;  %v671_v36 = vadd.f32 1.0, %v1416_v32  ;;  %v638_v38 = vmul.f32 1.442695, %v583_v28  ;;  %v545_v8 = vpop.f32.mrf.mxu0  ;;  %v754_v51 = vpack.c.bf16 %v726_v25, %v724_v19 }
 0x16b   : > { %v1418_v39 = vpop.eup %1417  ;;  %1443 = vpow2.f32 %v636_v22  ;;  %v640_v40 = vmul.f32 1.442695, %v584_v0  ;;  %v585_v41 = vsub.f32 0.0, %v1958_v34  ;;  %v1963_v43 = vadd.f32 %v545_v8, %v1846_v46 }
 0x16c   : > { %v1420_v12 = vpop.eup %1419  ;;  %1445 = vrcp.f32 %v671_v36  ;;  %v547_v44 = vpop.f32.mrf.mxu0  ;;  %v755_v48 = vpack.c.bf16 %v727_v33, %v725_v35  ;;  %v728_v5 = vmul.f32 %v1418_v39, %v1883_v16 }
 0x16d   : > { %v1422_v54 = vpop.eup %1421  ;;  %v672_v55 = vadd.f32 1.0, %v1420_v12  ;;  %1447 = vpow2.f32 %v638_v38  ;;  %v642_v4 = vmul.f32 1.442695, %v585_v41  ;;  %v586_v57 = vsub.f32 0.0, %v1963_v43 }
 0x16e   : > { %v1424_v56 = vpop.eup %1423  ;;  %1449 = vpow2.f32 %v640_v40  ;;  %v1967_v58 = vadd.f32 %v547_v44, %v1848_v47  ;;  %943 = vmatprep.mubr.bf16.mxu1 %v755_v48  ;;  %v551_v59 = vpop.f32.mrf.mxu0  ;;  %v729_v18 = vmul.f32 %v1422_v54, %v1887_v20 }
 0x16f   : > { %v1426_v62 = vpop.eup %1425  ;;  %1451 = vrcp.f32 %v672_v55  ;;  %v673_v63 = vadd.f32 1.0, %v1424_v56  ;;  %v644_v2 = vmul.f32 1.442695, %v586_v57  ;;  %v1970_v60 = vadd.f32 %v551_v59, %v1846_v46  ;;  %944 = vmatmul.mubr.bf16.gmra.mxu1 %v754_v51 }
 0x170   : > { %v1428_v3 = vpop.eup %1427  ;;  %v730_v6 = vmul.f32 %v1426_v62, %v1891_v27  ;;  %1453 = vpow2.f32 %v642_v4  ;;  %v587_v9 = vsub.f32 0.0, %v1967_v58  ;;  %v553_v10 = vpop.f32.mrf.mxu0 }
 0x171   : > { %v1430_v52 = vpop.eup %1429  ;;  %1455 = vrcp.f32 %v673_v63  ;;  %v674_v11 = vadd.f32 1.0, %v1428_v3  ;;  %v588_v15 = vsub.f32 0.0, %v1970_v60  ;;  %v1977_v49 = vadd.f32 %v553_v10, %v1848_v47 }
 0x172   : > { %v1432_v17 = vpop.eup %1431  ;;  %v731_v19 = vmul.f32 %v1430_v52, %v1894_v31  ;;  %1457 = vpow2.f32 %v644_v2  ;;  %v646_v16 = vmul.f32 1.442695, %v587_v9  ;;  %v555_v27 = vpop.f32.mrf.mxu0  ;;  %v756_v0 = vpack.c.bf16 %v730_v6, %v728_v5 }
 0x173   : > { %v1434_v22 = vpop.eup %1433  ;;  %1459 = vrcp.f32 %v674_v11  ;;  %v675_v24 = vadd.f32 1.0, %v1432_v17  ;;  %v648_v25 = vmul.f32 1.442695, %v588_v15  ;;  %v589_v26 = vsub.f32 0.0, %v1977_v49 }
 0x174   : > { %v1436_v28 = vpop.eup %1435  ;;  %1461 = vpow2.f32 %v646_v16  ;;  %v1983_v29 = vadd.f32 %v555_v27, %v1846_v46  ;;  %v557_v32 = vpop.f32.mrf.mxu0  ;;  %v757_v33 = vpack.c.bf16 %v731_v19, %v729_v18  ;;  %v732_v56 = vmul.f32 %v1434_v22, %v1899_v37 }
 0x175   : > { %v1438_v20 = vpop.eup %1437  ;;  %1463 = vrcp.f32 %v675_v24  ;;  %v676_v31 = vadd.f32 1.0, %v1436_v28  ;;  %v650_v35 = vmul.f32 1.442695, %v589_v26  ;;  %v1986_v36 = vadd.f32 %v557_v32, %v1848_v47 }
 0x176   : > { %v1440_v38 = vpop.eup %1439  ;;  %1465 = vpow2.f32 %v648_v25  ;;  %v590_v8 = vsub.f32 0.0, %v1983_v29  ;;  %951 = vmatprep.mubr.bf16.mxu1 %v757_v33  ;;  %v733_v55 = vmul.f32 %v1438_v20, %v1903_v45 }
 0x177   : > { %v1442_v39 = vpop.eup %1441  ;;  %1467 = vrcp.f32 %v676_v31  ;;  %v677_v40 = vadd.f32 1.0, %v1440_v38  ;;  %v591_v46 = vsub.f32 0.0, %v1986_v36  ;;  %952 = vmatmul.mubr.bf16.gmra.mxu1 %v756_v0 }
 0x178   : > { %v1444_v41 = vpop.eup %1443  ;;  %1469 = vpow2.f32 %v650_v35  ;;  %v652_v12 = vmul.f32 1.442695, %v590_v8  ;;  %v734_v48 = vmul.f32 %v1442_v39, %v1906_v53 }
 0x179   : > { %v1446_v44 = vpop.eup %1445  ;;  %1471 = vrcp.f32 %v677_v40  ;;  %v678_v47 = vadd.f32 1.0, %v1444_v41  ;;  %v654_v51 = vmul.f32 1.442695, %v591_v46 }
 0x17a   : > { %v1448_v54 = vpop.eup %1447  ;;  %v735_v4 = vmul.f32 %v1446_v44, %v1911_v61  ;;  %1473 = vpow2.f32 %v652_v12  ;;  %v758_v53 = vpack.c.bf16 %v734_v48, %v732_v56  ;;  %v2014_v56 = vld [vmem:[%s2104_s4] ss:$0 sm:$0xff] }
 0x17b   : > { %v1450_v57 = vpop.eup %1449  ;;  %1475 = vrcp.f32 %v678_v47  ;;  %v679_v59 = vadd.f32 1.0, %v1448_v54 }
 0x17c   : > { %v1452_v62 = vpop.eup %1451  ;;  %1477 = vpow2.f32 %v654_v51  ;;  %v759_v63 = vpack.c.bf16 %v735_v4, %v733_v55  ;;  %v680_v9 = vadd.f32 1.0, %v1450_v57 }
 0x17d   : > { %v1454_v2 = vpop.eup %1453  ;;  %1479 = vrcp.f32 %v679_v59  ;;  %v736_v16 = vmul.f32 %v1452_v62, %v1915_v7 }
 0x17e   : > { %v1456_v3 = vpop.eup %1455  ;;  %v681_v5 = vadd.f32 1.0, %v1454_v2  ;;  %959 = vmatprep.mubr.bf16.mxu1 %v759_v63 }
 0x17f   : > { %v1458_v6 = vpop.eup %1457  ;;  %960 = vmatmul.mubr.bf16.gmra.mxu1 %v758_v53  ;;  %v737_v17 = vmul.f32 %v1456_v3, %v1918_v13 }
 0x180   : > { %v1460_v45 = vpop.eup %1459  ;;  %v682_v61 = vadd.f32 1.0, %v1458_v6  ;;  %1481 = vrcp.f32 %v681_v5 }
 0x181   : > { %v1462_v10 = vpop.eup %1461  ;;  %v738_v37 = vmul.f32 %v1460_v45, %v1923_v21 }
 0x182   : > { %v1464_v52 = vpop.eup %1463  ;;  %1483 = vrcp.f32 %v682_v61  ;;  %v683_v11 = vadd.f32 1.0, %v1462_v10 }
 0x183   : > { %v1466_v15 = vpop.eup %1465  ;;  %v739_v18 = vmul.f32 %v1464_v52, %v1927_v30  ;;  %1485 = vrcp.f32 %v680_v9  ;;  %v760_v26 = vpack.c.bf16 %v738_v37, %v736_v16 }
 0x184   : > { %v1468_v19 = vpop.eup %1467  ;;  %1487 = vrcp.f32 %v683_v11  ;;  %v684_v32 = vadd.f32 1.0, %v1466_v15 }
 0x185   : > { %v1470_v27 = vpop.eup %1469  ;;  %v761_v22 = vpack.c.bf16 %v739_v18, %v737_v17  ;;  %v740_v35 = vmul.f32 %v1468_v19, %v1932_v42 }
 0x186   : > { %v1472_v24 = vpop.eup %1471  ;;  %v685_v25 = vadd.f32 1.0, %v1470_v27 }
 0x187   : > { %v1474_v28 = vpop.eup %1473  ;;  %967 = vmatprep.mubr.bf16.mxu1 %v761_v22  ;;  %v741_v7 = vmul.f32 %v1472_v24, %v1935_v50 }
 0x188   : > { %v1476_v21 = vpop.eup %1475  ;;  %v686_v33 = vadd.f32 1.0, %v1474_v28  ;;  %968 = vmatmul.mubr.bf16.gmra.mxu1 %v760_v26  ;;  %1489 = vrcp.f32 %v685_v25 }
 0x189   : > { %v1478_v0 = vpop.eup %1477  ;;  %v742_v30 = vmul.f32 %v1476_v21, %v1943_v1 }
 0x18a   : > { %v1480_v13 = vpop.eup %1479  ;;  %1491 = vrcp.f32 %v686_v33  ;;  %v687_v20 = vadd.f32 1.0, %v1478_v0 }
 0x18b   : > { %v743_v31 = vmul.f32 %v1480_v13, %v1947_v14  ;;  %1493 = vrcp.f32 %v684_v32  ;;  %v762_v39 = vpack.c.bf16 %v742_v30, %v740_v35 }
 0x18c   : > { %1495 = vrcp.f32 %v687_v20 }
 0x18d   : > { %v763_v38 = vpack.c.bf16 %v743_v31, %v741_v7  ;;  %v1482_v8 = vpop.eup %1481 }
 0x18e   : > { %v745_v1 = vmul.f32 %v1482_v8, %v1958_v34 }
 0x18f   : > { %v1484_v40 = vpop.eup %1483  ;;  %975 = vmatprep.mubr.bf16.mxu1 %v763_v38 }
 0x190   : > { %v1486_v46 = vpop.eup %1485  ;;  %976 = vmatmul.mubr.bf16.gmra.mxu1 %v762_v39  ;;  %v746_v12 = vmul.f32 %v1484_v40, %v1963_v43 }
 0x191   : > { %v1488_v41 = vpop.eup %1487  ;;  %v744_v14 = vmul.f32 %v1486_v46, %v1951_v23 }
 0x192   : > { %v747_v50 = vmul.f32 %v1488_v41, %v1967_v58 }
 0x193   : > { %v764_v42 = vpack.c.bf16 %v746_v12, %v744_v14 }
 0x194   : > { %v765_v44 = vpack.c.bf16 %v747_v50, %v745_v1 }
 0x195   : > { %v1490_v48 = vpop.eup %1489 }
 0x196   : > { %983 = vmatprep.mubr.bf16.mxu1 %v765_v44  ;;  %v749_v55 = vmul.f32 %v1490_v48, %v1977_v49 }
 0x197   : > { %v1492_v47 = vpop.eup %1491 }
 0x198   : > { %v1494_v51 = vpop.eup %1493  ;;  %984 = vmatmul.mubr.bf16.gmra.mxu1 %v764_v42  ;;  %v750_v4 = vmul.f32 %v1492_v47, %v1983_v29 }
 0x199   : > { %v1496_v54 = vpop.eup %1495  ;;  %v748_v43 = vmul.f32 %v1494_v51, %v1970_v60 }
 0x19a   : > { %v751_v34 = vmul.f32 %v1496_v54, %v1986_v36 }
 0x19b   : > { %v766_v23 = vpack.c.bf16 %v750_v4, %v748_v43 }
 0x19c   : > { %v767_v58 = vpack.c.bf16 %v751_v34, %v749_v55 }
 0x19e   : > { %991 = vmatprep.mubr.bf16.mxu1 %v767_v58 }
 0x1a0   : > { %992 = vmatmul.mubr.bf16.gmra.mxu1 %v766_v23 }
 0x226   : > { %v1199_v57 = vpop.f32.mrf.mxu1 }
 0x228   : > { %v1200_v59 = vpop.f32.mrf.mxu1 }
 0x229   : > { %v1201_v62 = vadd.f32 %v1200_v59, %v1199_v57 }
 0x22a   : > { %v1202_v49 = vpop.f32.mrf.mxu1 }
 0x22b   : > { %v938_v29 = vadd.f32 %v1201_v62, %v2014_v56 }
 0x22c   : > { %v1203_v63 = vpop.f32.mrf.mxu1 }
 0x22d   : > { %1000 = vst [vmem:[%s2017_s15] sm:$0xff] %v938_v29  ;;  %v1204_v60 = vadd.f32 %v1203_v63, %v1202_v49 }
 0x22f   : > { %v1205_v36 = vpop.f32.mrf.mxu1  ;;  %v941_v2 = vadd.f32 %v1204_v60, %v2014_v56 }
 0x231   : > { %v1206_v53 = vpop.f32.mrf.mxu1  ;;  %1001 = vst [vmem:[%s2017_s15 + $0x8] sm:$0xff] %v941_v2 }
 0x232   : > { %v1207_v3 = vadd.f32 %v1206_v53, %v1205_v36 }
 0x233   : > { %v1208_v5 = vpop.f32.mrf.mxu1 }
 0x234   : > { %v946_v6 = vadd.f32 %v1207_v3, %v2014_v56 }
 0x235   : > { %v1209_v9 = vpop.f32.mrf.mxu1 }
 0x236   : > { %1002 = vst [vmem:[%s2017_s15 + $0x10] sm:$0xff] %v946_v6  ;;  %v1210_v45 = vadd.f32 %v1209_v9, %v1208_v5 }
 0x237   : > { %v1211_v61 = vpop.f32.mrf.mxu1 }
 0x238   : > { %v949_v10 = vadd.f32 %v1210_v45, %v2014_v56 }
 0x239   : > { %v1212_v52 = vpop.f32.mrf.mxu1 }
 0x23a   : > { %1003 = vst [vmem:[%s2017_s15 + $0x18] sm:$0xff] %v949_v10  ;;  %v1213_v37 = vadd.f32 %v1212_v52, %v1211_v61 }
 0x23b   : > { %v1214_v11 = vpop.f32.mrf.mxu1 }
 0x23c   : > { %v954_v15 = vadd.f32 %v1213_v37, %v2014_v56 }
 0x23d   : > { %v1215_v17 = vpop.f32.mrf.mxu1 }
 0x23e   : > { %1004 = vst [vmem:[%s2017_s15 + $0x20] sm:$0xff] %v954_v15  ;;  %v1216_v18 = vadd.f32 %v1215_v17, %v1214_v11 }
 0x23f   : > { %v1217_v19 = vpop.f32.mrf.mxu1 }
 0x240   : > { %v957_v16 = vadd.f32 %v1216_v18, %v2014_v56 }
 0x241   : > { %v1218_v27 = vpop.f32.mrf.mxu1 }
 0x242   : > { %1005 = vst [vmem:[%s2017_s15 + $0x28] sm:$0xff] %v957_v16  ;;  %v1219_v22 = vadd.f32 %v1218_v27, %v1217_v19 }
 0x243   : > { %v1220_v24 = vpop.f32.mrf.mxu1 }
 0x244   : > { %v962_v25 = vadd.f32 %v1219_v22, %v2014_v56 }
 0x245   : > { %v1221_v26 = vpop.f32.mrf.mxu1 }
 0x246   : > { %1006 = vst [vmem:[%s2017_s15 + $0x30] sm:$0xff] %v962_v25  ;;  %v1222_v28 = vadd.f32 %v1221_v26, %v1220_v24 }
 0x248   : > { %v965_v32 = vadd.f32 %v1222_v28, %v2014_v56  ;;  %v1223_v21 = vpop.f32.mrf.mxu1 }
 0x24a   : > { %1007 = vst [vmem:[%s2017_s15 + $0x38] sm:$0xff] %v965_v32  ;;  %v1224_v33 = vpop.f32.mrf.mxu1 }
 0x24b   : > { %v1225_v0 = vadd.f32 %v1224_v33, %v1223_v21 }
 0x24c   : > { %v1226_v13 = vpop.f32.mrf.mxu1 }
 0x24d   : > { %v970_v30 = vadd.f32 %v1225_v0, %v2014_v56 }
 0x24e   : > { %v1227_v20 = vpop.f32.mrf.mxu1 }
 0x24f   : > { %1008 = vst [vmem:[%s2017_s15 + $0x40] sm:$0xff] %v970_v30  ;;  %v1228_v7 = vadd.f32 %v1227_v20, %v1226_v13 }
 0x250   : > { %v1229_v31 = vpop.f32.mrf.mxu1 }
 0x251   : > { %v973_v35 = vadd.f32 %v1228_v7, %v2014_v56 }
 0x252   : > { %v1230_v38 = vpop.f32.mrf.mxu1 }
 0x253   : > { %1009 = vst [vmem:[%s2017_s15 + $0x48] sm:$0xff] %v973_v35  ;;  %v1231_v8 = vadd.f32 %v1230_v38, %v1229_v31 }
 0x254   : > { %v1232_v39 = vpop.f32.mrf.mxu1 }
 0x255   : > { %v978_v40 = vadd.f32 %v1231_v8, %v2014_v56 }
 0x256   : > { %v1233_v46 = vpop.f32.mrf.mxu1 }
 0x257   : > { %1010 = vst [vmem:[%s2017_s15 + $0x50] sm:$0xff] %v978_v40  ;;  %v1234_v41 = vadd.f32 %v1233_v46, %v1232_v39 }
 0x258   : > { %v1235_v1 = vpop.f32.mrf.mxu1 }
 0x259   : > { %v981_v12 = vadd.f32 %v1234_v41, %v2014_v56 }
 0x25a   : > { %v1236_v50 = vpop.f32.mrf.mxu1 }
 0x25b   : > { %1011 = vst [vmem:[%s2017_s15 + $0x58] sm:$0xff] %v981_v12  ;;  %v1237_v14 = vadd.f32 %v1236_v50, %v1235_v1 }
 0x25c   : > { %v1238_v44 = vpop.f32.mrf.mxu1 }
 0x25d   : > { %v986_v48 = vadd.f32 %v1237_v14, %v2014_v56 }
 0x25e   : > { %v1239_v42 = vpop.f32.mrf.mxu1 }
 0x25f   : > { %1012 = vst [vmem:[%s2017_s15 + $0x60] sm:$0xff] %v986_v48  ;;  %v1240_v47 = vadd.f32 %v1239_v42, %v1238_v44 }
 0x260   : > { %v1241_v51 = vpop.f32.mrf.mxu1 }
 0x261   : > { %v989_v54 = vadd.f32 %v1240_v47, %v2014_v56 }
 0x262   : > { %v1242_v55 = vpop.f32.mrf.mxu1 }
 0x263   : > { %1013 = vst [vmem:[%s2017_s15 + $0x68] sm:$0xff] %v989_v54  ;;  %v1243_v4 = vadd.f32 %v1242_v55, %v1241_v51 }
 0x264   : > { %v1244_v34 = vpop.f32.mrf.mxu1 }
 0x265   : > { %v994_v43 = vadd.f32 %v1243_v4, %v2014_v56 }
 0x266   : > { %v1245_v58 = vpop.f32.mrf.mxu1 }
 0x267   : > { %1014 = vst [vmem:[%s2017_s15 + $0x70] sm:$0xff] %v994_v43  ;;  %v1246_v23 = vadd.f32 %v1245_v58, %v1244_v34 }
 0x269   : > { %v997_v57 = vadd.f32 %v1246_v23, %v2014_v56 }
 0x26b   : > { %1015 = vst [vmem:[%s2017_s15 + $0x78] sm:$0xff] %v997_v57 }
 0x26c   : > { %1590 = shalt.err (!%p1587_p9)
}
 0x26d   : > { %s1591_s24 = scalar_lea.hbm %s2053_s27, 2048  ;;  %s1595_s10 = scalar_lea.hbm %s2105_s5, 4096 }
 0x26e   : > { %p1592_p13 = scmp.ne.s32.totalorder %s2053_s27, %s1591_s24  ;;  %p1596_p4 = scmp.lt.s32.totalorder %s2053_s27, %s2105_s5 }
 0x26f   : > { %p1597_p8 = scmp.lt.s32.totalorder %s1595_s10, %s1591_s24 }
 0x270   : > { %p1593_p5 = pnand %p1592_p13, %p2123_p10 }
 0x271   : > { %p1598_p7 = por %p1597_p8, %p1596_p4 }
 0x272   : > { %p1594_p0 = pneg %p1593_p5 }
 0x274   : > { %p1599_p11 = pnand %p1598_p7, %p1594_p0 }
 0x276   : > { %1602 = shalt.err (!%p1599_p11)
}
 0x277   : > { %s1656_s16 = smov 128   ;;  %s1657_s30 = smov 8  }
 0x278   : > { %1257 = dma.vmem_to_hbm [thread:$0]  (%p2123_p10), %s2055_s9, 2048, %s2053_s27, %s1017_s23, %s1656_s16, %s1656_s16, %s1657_s30  }
 0x279 PF: > { %s1045_s11 = sand.u32 1, %s1633_s18   ;;  %p2124_p1 = scmp.ne.s32.totalorder %s2112_s25, 0 }
 0x27a   : > { %p2125_p2 = scmp.ge.s32.totalorder %s1645_s21, 2  ;;  %s1046_s13 = scalar_lea.sflag [#allocation4], %s1045_s11 }
 0x27c   : > { %p1271_p6 = pnand %p2125_p2, %p2124_p1 }
 0x27e   : > { %p1272_p12 = pneg %p1271_p6 }
 0x280   : > { %1628 = dma.done.wait (%p1272_p12), %s1046_s13, 2048  }
 0x281   : > { %1630 = vsyncadd (%p1272_p12), %s1046_s13, 4294965248  ;;  %p19_p3 = scmp.ge.s32.totalorder %s1763_s17, 4   ;;  %s2126_s18 = smov %s1637_s19 }
 0x282   : > { %s2127_s19 = smov %s1641_s20  ;;  %s2128_s20 = smov %s1772_s28 }
 0x283   : > { %s2129_s21 = smov %s1763_s17  ;;  %21 = sbr.rel (!%p19_p3) target bundleno = 6 (0x6), region = 93 }
 0x288   :  { %1051 = vsyncpa [#allocation3], 1 }
 0x289   :  { %1053 = vsyncpa [#allocation3 + $0x1], 1 }
 0x28a   :  { %1054 = vsyncpa [#allocation6], 1 }
 0x28b   :  { %1055 = vsyncpa [#allocation4], 1 }
 0x28c   :  { %1057 = vsyncpa [#allocation4 + $0x1], 1 }

</bundles_post_ra>
